<compile_context>
chip_gen: v6e
topology: v6e:2x2x1
jax: 0.10.0
libtpu: 0.0.40
codegen_flags: <defaults>
</compile_context>

<pallas_src>
import functools

import jax
import jax.numpy as jnp
from jax import lax
from jax.experimental import pallas as pl
from jax.experimental.pallas import tpu as pltpu


# ----------------------------------------------------------------------------
# Kernel: one (batch, query-tile) grid cell.
#   qt == 0 : fused QKV projection for the whole sequence -> VMEM scratch
#   every qt: per-head causal attention on a (tq, T) score tile -> concat
#             scratch -> output projection -> lane-dense (tq, C) store.
# ----------------------------------------------------------------------------
def _fused_mha_kernel(x_ref, wqkv_ref, wprojT_ref, bproj_ref, o_ref,
                      q_scr, kv_scr, cat_scr,
                      *, num_heads, head_size, q_tile, compute_dtype):
    H, hs, tq = num_heads, head_size, q_tile
    Dh = H * hs
    T = x_ref.shape[1]
    nq = T // tq
    qt = pl.program_id(1)

    # --- QKV projection: once per batch element (first query tile) ----------
    @pl.when(qt == 0)
    def _():
        x = x_ref[0].astype(compute_dtype)                         # (T, C)
        # One wide matmul (scale already folded into the Q columns of w_qkv).
        qkv = jnp.dot(x, wqkv_ref[...],
                      preferred_element_type=jnp.float32)          # (T, 3*Dh)
        qkv = qkv.astype(compute_dtype)
        # Q stored head-tiled on the leading axis -> dynamic read is a
        # leading-dim index only.  K/V stay (T, 2*Dh), read with static slices.
        q_scr[...] = qkv[:, :Dh].reshape(nq, tq, Dh)
        kv_scr[...] = qkv[:, Dh:]

    # Causal-mask constants for this query tile (shared by every head).
    row = lax.broadcasted_iota(jnp.int32, (tq, T), 0) + qt * tq
    col = lax.broadcasted_iota(jnp.int32, (tq, T), 1)
    causal = row >= col
    neg_big = jnp.float32(-1e30)

    q_all = q_scr[qt]                                               # (tq, Dh)

    # Static unroll over heads: H is small for this module; static slice
    # offsets avoid dynamic-lane-slice relayouts, and each head's result is
    # immediately stored into the concat scratch (no list / lane concat).
    for h in range(H):
        lo = h * hs
        q = q_all[:, lo:lo + hs]                                    # (tq, hs)
        k = kv_scr[:, lo:lo + hs]                                   # (T,  hs)
        v = kv_scr[:, Dh + lo:Dh + lo + hs]                         # (T,  hs)

        # q @ k^T without an explicit transpose (contract last dims).
        wei = lax.dot_general(q, k, (((1,), (1,)), ((), ())),
                              preferred_element_type=jnp.float32)   # (tq, T)
        wei = jnp.where(causal, wei, neg_big)

        # Numerically-stable softmax; math stays in f32.
        m = jnp.max(wei, axis=-1, keepdims=True)
        e = jnp.exp(wei - m)
        denom = jnp.sum(e, axis=-1, keepdims=True)
        inv = pl.reciprocal(denom, approx=True)     # EUP slot, not VALU divide

        o_h = jnp.dot(e.astype(compute_dtype), v,
                      preferred_element_type=jnp.float32)           # (tq, hs)
        # Matches torch.cat([head_0, head_1, ...], dim=-1) ordering.
        cat_scr[:, lo:lo + hs] = o_h * inv

    # --- output projection: y = concat @ W_proj^T + b ------------------------
    y = jnp.dot(cat_scr[...].astype(compute_dtype), wprojT_ref[...],
                preferred_element_type=jnp.float32)                 # (tq, C)
    y = y + bproj_ref[...]
    # TODO(synk): dropout after proj is identity (eval mode).
    o_ref[0] = y.astype(o_ref.dtype)


# ----------------------------------------------------------------------------
# Parameter prep (run ONCE at init, not on every forward call)
# ----------------------------------------------------------------------------
def prepare_mha_params(wq, wk, wv, w_proj, b_proj, *,
                       compute_dtype=jnp.bfloat16):
    """
    wq/wk/wv: (H, C, hs)   per-head projection weights (y = x @ w[h])
    w_proj  : (C, H*hs)    PyTorch Linear weight layout (out, in)
    b_proj  : (C,)
    Folds the 1/sqrt(hs) scale into the Q columns and stacks all per-head
    weights into one (C, 3*H*hs) matrix so the kernel issues a single wide
    MXU matmul.  compute_dtype only affects MXU operands; accumulation and
    softmax stay f32 in-kernel.
    """
    H, C, hs = wq.shape
    Dh = H * hs
    scale = jnp.asarray(hs, jnp.float32) ** -0.5

    def _flat(w):                        # (H, C, hs) -> (C, H*hs)
        return jnp.transpose(w, (1, 0, 2)).reshape(C, Dh)

    w_qkv = jnp.concatenate(
        [_flat(wq).astype(jnp.float32) * scale, _flat(wk), _flat(wv)], axis=1)
    return dict(
        w_qkv=w_qkv.astype(compute_dtype),           # (C, 3*Dh)
        w_projT=w_proj.T.astype(compute_dtype),      # (Dh, C), pre-transposed
        b_proj=b_proj.reshape(1, C).astype(jnp.float32),
        num_heads=H, head_size=hs, compute_dtype=compute_dtype)


def _pick_q_tile(T):
    for cand in (256, 128, 64, 32, 16, 8):
        if T >= cand and T % cand == 0:
            return cand
    return T


# ----------------------------------------------------------------------------
# Forward wrapper
# ----------------------------------------------------------------------------
def multi_head_attention(x, params, *, q_tile=None):
    """x: (B, T, C); params from prepare_mha_params.  Returns (B, T, C)."""
    B, T, C = x.shape
    H = params["num_heads"]
    hs = params["head_size"]
    Dh = H * hs
    compute_dtype = params["compute_dtype"]
    w_qkv, w_projT, b2 = params["w_qkv"], params["w_projT"], params["b_proj"]
    assert w_qkv.shape == (C, 3 * Dh) and w_projT.shape == (Dh, C)

    if q_tile is None:
        q_tile = _pick_q_tile(T)
    assert T % q_tile == 0, "q_tile must divide T"
    nq = T // q_tile

    x_in = x.astype(compute_dtype)

    # Explicit VMEM budget (default scoped VMEM is only 16/32 MiB).
    cd = jnp.dtype(compute_dtype).itemsize
    od = jnp.dtype(x.dtype).itemsize
    est = (2 * (T * C * cd                 # x block (double-buffered)
                + C * 3 * Dh * cd          # fused QKV weights
                + Dh * C * cd              # proj weights
                + C * 4                    # bias
                + q_tile * C * od)         # out block
           + nq * q_tile * Dh * cd         # Q scratch
           + T * 2 * Dh * cd               # K/V scratch
           + q_tile * Dh * 4               # concat scratch
           + T * 3 * Dh * 4                # f32 QKV temporary
           + 4 * q_tile * T * 4)           # score/exp temporaries
    vmem_limit = int(min(max(2 * est, 32 * 2**20), 96 * 2**20))

    kernel = functools.partial(_fused_mha_kernel, num_heads=H, head_size=hs,
                               q_tile=q_tile, compute_dtype=compute_dtype)

    return pl.pallas_call(
        kernel,
        out_shape=jax.ShapeDtypeStruct((B, T, C), x.dtype),
        grid_spec=pltpu.PrefetchScalarGridSpec(
            num_scalar_prefetch=0,
            grid=(B, nq),                                  # batch x query-tile
            in_specs=[
                pl.BlockSpec((1, T, C), lambda b, qt: (b, 0, 0)),   # x (1 DMA/b)
                pl.BlockSpec((C, 3 * Dh), lambda b, qt: (0, 0)),    # fused QKV w
                pl.BlockSpec((Dh, C), lambda b, qt: (0, 0)),        # proj w^T
                pl.BlockSpec((1, C), lambda b, qt: (0, 0)),         # proj bias
            ],
            out_specs=pl.BlockSpec((1, q_tile, C), lambda b, qt: (b, qt, 0)),
            scratch_shapes=[
                pltpu.VMEM((nq, q_tile, Dh), compute_dtype),   # Q (head-tiled)
                pltpu.VMEM((T, 2 * Dh), compute_dtype),        # K, V
                pltpu.VMEM((q_tile, Dh), jnp.float32),         # concat scratch
            ],
        ),
        compiler_params=pltpu.CompilerParams(
            dimension_semantics=("parallel", "arbitrary"),
            vmem_limit_bytes=vmem_limit),
    )(x_in, w_qkv, w_projT, b2)


# ----------------------------------------------------------------------------
# Pure-JAX reference (for correctness check)
# ----------------------------------------------------------------------------
def reference(x, wq, wk, wv, w_proj, b_proj):
    B, T, C = x.shape
    H, _, hs = wq.shape
    q = jnp.einsum('btc,hcd->bhtd', x, wq)
    k = jnp.einsum('btc,hcd->bhtd', x, wk)
    v = jnp.einsum('btc,hcd->bhtd', x, wv)
    wei = jnp.einsum('bhtd,bhsd->bhts', q, k) * hs ** -0.5
    mask = jnp.tril(jnp.ones((T, T), dtype=bool))
    wei = jnp.where(mask, wei, -jnp.inf)
    p = jax.nn.softmax(wei, axis=-1)
    o = jnp.einsum('bhts,bhsd->bhtd', p, v)
    concat = jnp.transpose(o, (0, 2, 1, 3)).reshape(B, T, H * hs)
    return concat @ w_proj.T + b_proj


if __name__ == "__main__":
    # Small config consistent with the module: n_embd=32, num_heads=4,
    # head_size=8, block_size (max seq) = 8, batch=2, dropout=0 (eval).
    B, T, C = 2, 8, 32
    H, hs = 4, 8

    key = jax.random.PRNGKey(0)
    kx, kq, kk, kv, kw, kb = jax.random.split(key, 6)

    x = jax.random.normal(kx, (B, T, C), dtype=jnp.float32)
    wq = jax.random.normal(kq, (H, C, hs), dtype=jnp.float32) * 0.1
    wk = jax.random.normal(kk, (H, C, hs), dtype=jnp.float32) * 0.1
    wv = jax.random.normal(kv, (H, C, hs), dtype=jnp.float32) * 0.1
    # PyTorch Linear(head_size*num_heads -> n_embd): weight (out,in), bias (out,)
    w_proj = jax.random.normal(kw, (C, H * hs), dtype=jnp.float32) * 0.1
    b_proj = jax.random.normal(kb, (C,), dtype=jnp.float32) * 0.1

    ref = reference(x, wq, wk, wv, w_proj, b_proj)

    # f32 MXU path: tight-tolerance correctness check.
    params_f32 = prepare_mha_params(wq, wk, wv, w_proj, b_proj,
                                    compute_dtype=jnp.float32)
    out_f32 = jax.block_until_ready(multi_head_attention(x, params_f32))
    assert out_f32.shape == (B, T, C)
    # Tolerance loosened slightly for the approximate (EUP) reciprocal.
    assert jnp.allclose(out_f32, ref, atol=2e-3, rtol=2e-3), "f32 mismatch"

    # Default bf16-MXU path (v6e/v7x recommendation): loose sanity check.
    params_bf16 = prepare_mha_params(wq, wk, wv, w_proj, b_proj)
    out_bf16 = jax.block_until_ready(multi_head_attention(x, params_bf16))
    assert out_bf16.shape == (B, T, C)
    assert jnp.allclose(out_bf16, ref, atol=1e-1, rtol=1e-1), "bf16 mismatch"

    print("KERNEL_OK")
</pallas_src>

<mosaic_0001>
module attributes {stable_mosaic.version = 11 : i64} {
  func.func @_fused_mha_kernel(%arg0: i32, %arg1: i32, %arg2: memref<1x8x32xf32, #tpu.memory_space<vmem>>, %arg3: memref<32x96xf32, #tpu.memory_space<vmem>>, %arg4: memref<32x32xf32, #tpu.memory_space<vmem>>, %arg5: memref<1x32xf32, #tpu.memory_space<vmem>>, %arg6: memref<1x8x32xf32, #tpu.memory_space<vmem>>, %arg7: memref<1x8x32xf32, #tpu.memory_space<vmem>>, %arg8: memref<8x64xf32, #tpu.memory_space<vmem>>, %arg9: memref<8x32xf32, #tpu.memory_space<vmem>>) attributes {dimension_semantics = [#tpu.dimension_semantics<parallel>, #tpu.dimension_semantics<arbitrary>], iteration_bounds = array<i64: 2, 1>, scalar_prefetch = 0 : i64, scratch_operands = 3 : i64, tpu.core_type = #tpu.core_type<tc>, window_params = [{transform_indices = @transform_0, window_bounds = array<i64: 1, 8, 32>}, {pipeline_mode = #tpu.pipeline_mode<synchronous>, transform_indices = @transform_1, window_bounds = array<i64: 32, 96>}, {pipeline_mode = #tpu.pipeline_mode<synchronous>, transform_indices = @transform_2, window_bounds = array<i64: 32, 32>}, {pipeline_mode = #tpu.pipeline_mode<synchronous>, transform_indices = @transform_3, window_bounds = array<i64: 1, 32>}, {transform_indices = @transform_4, window_bounds = array<i64: 1, 8, 32>}]} {
    %c0_i32 = arith.constant 0 : i32
    %0 = arith.cmpi eq, %arg1, %c0_i32 : i32
    %1 = arith.extui %0 : i1 to i32
    %c0_i32_0 = arith.constant 0 : i32
    %2 = arith.cmpi ne, %1, %c0_i32_0 : i32
    scf.if %2 {
      %c0_48 = arith.constant 0 : index
      %c0_49 = arith.constant 0 : index
      %c0_50 = arith.constant 0 : index
      %93 = vector.load %arg2[%c0_48, %c0_49, %c0_50] : memref<1x8x32xf32, #tpu.memory_space<vmem>>, vector<1x8x32xf32>
      %94 = vector.shape_cast %93 : vector<1x8x32xf32> to vector<8x32xf32>
      %c0_51 = arith.constant 0 : index
      %c0_52 = arith.constant 0 : index
      %95 = vector.load %arg3[%c0_51, %c0_52] : memref<32x96xf32, #tpu.memory_space<vmem>>, vector<32x96xf32>
      %cst_53 = arith.constant dense<0.000000e+00> : vector<8x96xf32>
      %96 = tpu.matmul %94, %95, %cst_53 {dimension_numbers = #tpu.dot_dimension_numbers<[1], [0], [0], [1], [0, 0, 1, 1], [], []>} : vector<8x32xf32>, vector<32x96xf32>, vector<8x96xf32> -> vector<8x96xf32>
      %97 = vector.extract_strided_slice %96 {offsets = [0, 0], sizes = [8, 32], strides = [1, 1]} : vector<8x96xf32> to vector<8x32xf32>
      %98 = vector.shape_cast %97 : vector<8x32xf32> to vector<1x8x32xf32>
      %c0_54 = arith.constant 0 : index
      %c0_55 = arith.constant 0 : index
      %c0_56 = arith.constant 0 : index
      %99 = vector.load %arg7[%c0_54, %c0_55, %c0_56] : memref<1x8x32xf32, #tpu.memory_space<vmem>>, vector<1x8x32xf32>
      tpu.vector_store %arg7[%c0_54, %c0_55, %c0_56], %98 {strides = array<i32>} : memref<1x8x32xf32, #tpu.memory_space<vmem>>, vector<1x8x32xf32>,
      %100 = vector.extract_strided_slice %96 {offsets = [0, 32], sizes = [8, 64], strides = [1, 1]} : vector<8x96xf32> to vector<8x64xf32>
      %c0_57 = arith.constant 0 : index
      %c0_58 = arith.constant 0 : index
      %101 = vector.load %arg8[%c0_57, %c0_58] : memref<8x64xf32, #tpu.memory_space<vmem>>, vector<8x64xf32>
      tpu.vector_store %arg8[%c0_57, %c0_58], %100 {strides = array<i32>} : memref<8x64xf32, #tpu.memory_space<vmem>>, vector<8x64xf32>,
    } else {
    }
    %3 = tpu.iota {dimensions = array<i32: 0>} : vector<8x8xi32>
    %c8_i32 = arith.constant 8 : i32
    %4 = arith.muli %arg1, %c8_i32 : i32
    %5 = vector.broadcast %4 : i32 to vector<8x8xi32>
    %6 = arith.addi %3, %5 : vector<8x8xi32>
    %7 = tpu.iota {dimensions = array<i32: 1>} : vector<8x8xi32>
    %8 = arith.cmpi sge, %6, %7 : vector<8x8xi32>
    %9 = arith.index_cast %arg1 : i32 to index
    %c0 = arith.constant 0 : index
    %c0_1 = arith.constant 0 : index
    %10 = vector.load %arg7[%9, %c0, %c0_1] : memref<1x8x32xf32, #tpu.memory_space<vmem>>, vector<1x8x32xf32>
    %11 = vector.shape_cast %10 : vector<1x8x32xf32> to vector<8x32xf32>
    %12 = vector.extract_strided_slice %11 {offsets = [0, 0], sizes = [8, 8], strides = [1, 1]} : vector<8x32xf32> to vector<8x8xf32>
    %c0_2 = arith.constant 0 : index
    %c0_3 = arith.constant 0 : index
    %13 = vector.load %arg8[%c0_2, %c0_3] : memref<8x64xf32, #tpu.memory_space<vmem>>, vector<8x8xf32>
    %c0_4 = arith.constant 0 : index
    %c32 = arith.constant 32 : index
    %14 = vector.load %arg8[%c0_4, %c32] : memref<8x64xf32, #tpu.memory_space<vmem>>, vector<8x8xf32>
    %cst = arith.constant dense<0.000000e+00> : vector<8x8xf32>
    %15 = tpu.matmul %12, %13, %cst {dimension_numbers = #tpu.dot_dimension_numbers<[1], [1], [0], [0], [0, 0, 1, 0], [], []>} : vector<8x8xf32>, vector<8x8xf32>, vector<8x8xf32> -> vector<8x8xf32>
    %cst_5 = arith.constant -1.000000e+30 : f32
    %16 = vector.broadcast %cst_5 : f32 to vector<8x8xf32>
    %17 = arith.select %8, %15, %16 : vector<8x8xi1>, vector<8x8xf32>
    %cst_6 = arith.constant dense<0xFF800000> : vector<8xf32>
    %18 = vector.multi_reduction <maximumf>, %17, %cst_6 [1] : vector<8x8xf32> to vector<8xf32>
    %19 = vector.shape_cast %18 : vector<8xf32> to vector<8x1xf32>
    %20 = vector.broadcast %19 : vector<8x1xf32> to vector<8x8xf32>
    %21 = arith.subf %17, %20 : vector<8x8xf32>
    %22 = math.exp %21 : vector<8x8xf32>
    %cst_7 = arith.constant dense<0.000000e+00> : vector<8xf32>
    %23 = vector.multi_reduction <add>, %22, %cst_7 [1] : vector<8x8xf32> to vector<8xf32>
    %24 = vector.shape_cast %23 : vector<8xf32> to vector<8x1xf32>
    %25 = tpu.reciprocal %24 {approx = true} : vector<8x1xf32> -> vector<8x1xf32>
    %cst_8 = arith.constant dense<0.000000e+00> : vector<8x8xf32>
    %26 = tpu.matmul %22, %14, %cst_8 {dimension_numbers = #tpu.dot_dimension_numbers<[1], [0], [0], [1], [0, 0, 1, 1], [], []>} : vector<8x8xf32>, vector<8x8xf32>, vector<8x8xf32> -> vector<8x8xf32>
    %27 = vector.broadcast %25 : vector<8x1xf32> to vector<8x8xf32>
    %28 = arith.mulf %26, %27 : vector<8x8xf32>
    %c0_9 = arith.constant 0 : index
    %c0_10 = arith.constant 0 : index
    %29 = vector.load %arg9[%c0_9, %c0_10] : memref<8x32xf32, #tpu.memory_space<vmem>>, vector<8x8xf32>
    tpu.vector_store %arg9[%c0_9, %c0_10], %28 {strides = array<i32>} : memref<8x32xf32, #tpu.memory_space<vmem>>, vector<8x8xf32>,
    %30 = vector.extract_strided_slice %11 {offsets = [0, 8], sizes = [8, 8], strides = [1, 1]} : vector<8x32xf32> to vector<8x8xf32>
    %c0_11 = arith.constant 0 : index
    %c8 = arith.constant 8 : index
    %31 = vector.load %arg8[%c0_11, %c8] : memref<8x64xf32, #tpu.memory_space<vmem>>, vector<8x8xf32>
    %c0_12 = arith.constant 0 : index
    %c40 = arith.constant 40 : index
    %32 = vector.load %arg8[%c0_12, %c40] : memref<8x64xf32, #tpu.memory_space<vmem>>, vector<8x8xf32>
    %cst_13 = arith.constant dense<0.000000e+00> : vector<8x8xf32>
    %33 = tpu.matmul %30, %31, %cst_13 {dimension_numbers = #tpu.dot_dimension_numbers<[1], [1], [0], [0], [0, 0, 1, 0], [], []>} : vector<8x8xf32>, vector<8x8xf32>, vector<8x8xf32> -> vector<8x8xf32>
    %cst_14 = arith.constant -1.000000e+30 : f32
    %34 = vector.broadcast %cst_14 : f32 to vector<8x8xf32>
    %35 = arith.select %8, %33, %34 : vector<8x8xi1>, vector<8x8xf32>
    %cst_15 = arith.constant dense<0xFF800000> : vector<8xf32>
    %36 = vector.multi_reduction <maximumf>, %35, %cst_15 [1] : vector<8x8xf32> to vector<8xf32>
    %37 = vector.shape_cast %36 : vector<8xf32> to vector<8x1xf32>
    %38 = vector.broadcast %37 : vector<8x1xf32> to vector<8x8xf32>
    %39 = arith.subf %35, %38 : vector<8x8xf32>
    %40 = math.exp %39 : vector<8x8xf32>
    %cst_16 = arith.constant dense<0.000000e+00> : vector<8xf32>
    %41 = vector.multi_reduction <add>, %40, %cst_16 [1] : vector<8x8xf32> to vector<8xf32>
    %42 = vector.shape_cast %41 : vector<8xf32> to vector<8x1xf32>
    %43 = tpu.reciprocal %42 {approx = true} : vector<8x1xf32> -> vector<8x1xf32>
    %cst_17 = arith.constant dense<0.000000e+00> : vector<8x8xf32>
    %44 = tpu.matmul %40, %32, %cst_17 {dimension_numbers = #tpu.dot_dimension_numbers<[1], [0], [0], [1], [0, 0, 1, 1], [], []>} : vector<8x8xf32>, vector<8x8xf32>, vector<8x8xf32> -> vector<8x8xf32>
    %45 = vector.broadcast %43 : vector<8x1xf32> to vector<8x8xf32>
    %46 = arith.mulf %44, %45 : vector<8x8xf32>
    %c0_18 = arith.constant 0 : index
    %c8_19 = arith.constant 8 : index
    %47 = vector.load %arg9[%c0_18, %c8_19] : memref<8x32xf32, #tpu.memory_space<vmem>>, vector<8x8xf32>
    tpu.vector_store %arg9[%c0_18, %c8_19], %46 {strides = array<i32>} : memref<8x32xf32, #tpu.memory_space<vmem>>, vector<8x8xf32>,
    %48 = vector.extract_strided_slice %11 {offsets = [0, 16], sizes = [8, 8], strides = [1, 1]} : vector<8x32xf32> to vector<8x8xf32>
    %c0_20 = arith.constant 0 : index
    %c16 = arith.constant 16 : index
    %49 = vector.load %arg8[%c0_20, %c16] : memref<8x64xf32, #tpu.memory_space<vmem>>, vector<8x8xf32>
    %c0_21 = arith.constant 0 : index
    %c48 = arith.constant 48 : index
    %50 = vector.load %arg8[%c0_21, %c48] : memref<8x64xf32, #tpu.memory_space<vmem>>, vector<8x8xf32>
    %cst_22 = arith.constant dense<0.000000e+00> : vector<8x8xf32>
    %51 = tpu.matmul %48, %49, %cst_22 {dimension_numbers = #tpu.dot_dimension_numbers<[1], [1], [0], [0], [0, 0, 1, 0], [], []>} : vector<8x8xf32>, vector<8x8xf32>, vector<8x8xf32> -> vector<8x8xf32>
    %cst_23 = arith.constant -1.000000e+30 : f32
    %52 = vector.broadcast %cst_23 : f32 to vector<8x8xf32>
    %53 = arith.select %8, %51, %52 : vector<8x8xi1>, vector<8x8xf32>
    %cst_24 = arith.constant dense<0xFF800000> : vector<8xf32>
    %54 = vector.multi_reduction <maximumf>, %53, %cst_24 [1] : vector<8x8xf32> to vector<8xf32>
    %55 = vector.shape_cast %54 : vector<8xf32> to vector<8x1xf32>
    %56 = vector.broadcast %55 : vector<8x1xf32> to vector<8x8xf32>
    %57 = arith.subf %53, %56 : vector<8x8xf32>
    %58 = math.exp %57 : vector<8x8xf32>
    %cst_25 = arith.constant dense<0.000000e+00> : vector<8xf32>
    %59 = vector.multi_reduction <add>, %58, %cst_25 [1] : vector<8x8xf32> to vector<8xf32>
    %60 = vector.shape_cast %59 : vector<8xf32> to vector<8x1xf32>
    %61 = tpu.reciprocal %60 {approx = true} : vector<8x1xf32> -> vector<8x1xf32>
    %cst_26 = arith.constant dense<0.000000e+00> : vector<8x8xf32>
    %62 = tpu.matmul %58, %50, %cst_26 {dimension_numbers = #tpu.dot_dimension_numbers<[1], [0], [0], [1], [0, 0, 1, 1], [], []>} : vector<8x8xf32>, vector<8x8xf32>, vector<8x8xf32> -> vector<8x8xf32>
    %63 = vector.broadcast %61 : vector<8x1xf32> to vector<8x8xf32>
    %64 = arith.mulf %62, %63 : vector<8x8xf32>
    %c0_27 = arith.constant 0 : index
    %c16_28 = arith.constant 16 : index
    %65 = vector.load %arg9[%c0_27, %c16_28] : memref<8x32xf32, #tpu.memory_space<vmem>>, vector<8x8xf32>
    tpu.vector_store %arg9[%c0_27, %c16_28], %64 {strides = array<i32>} : memref<8x32xf32, #tpu.memory_space<vmem>>, vector<8x8xf32>,
    %66 = vector.extract_strided_slice %11 {offsets = [0, 24], sizes = [8, 8], strides = [1, 1]} : vector<8x32xf32> to vector<8x8xf32>
    %c0_29 = arith.constant 0 : index
    %c24 = arith.constant 24 : index
    %67 = vector.load %arg8[%c0_29, %c24] : memref<8x64xf32, #tpu.memory_space<vmem>>, vector<8x8xf32>
    %c0_30 = arith.constant 0 : index
    %c56 = arith.constant 56 : index
    %68 = vector.load %arg8[%c0_30, %c56] : memref<8x64xf32, #tpu.memory_space<vmem>>, vector<8x8xf32>
    %cst_31 = arith.constant dense<0.000000e+00> : vector<8x8xf32>
    %69 = tpu.matmul %66, %67, %cst_31 {dimension_numbers = #tpu.dot_dimension_numbers<[1], [1], [0], [0], [0, 0, 1, 0], [], []>} : vector<8x8xf32>, vector<8x8xf32>, vector<8x8xf32> -> vector<8x8xf32>
    %cst_32 = arith.constant -1.000000e+30 : f32
    %70 = vector.broadcast %cst_32 : f32 to vector<8x8xf32>
    %71 = arith.select %8, %69, %70 : vector<8x8xi1>, vector<8x8xf32>
    %cst_33 = arith.constant dense<0xFF800000> : vector<8xf32>
    %72 = vector.multi_reduction <maximumf>, %71, %cst_33 [1] : vector<8x8xf32> to vector<8xf32>
    %73 = vector.shape_cast %72 : vector<8xf32> to vector<8x1xf32>
    %74 = vector.broadcast %73 : vector<8x1xf32> to vector<8x8xf32>
    %75 = arith.subf %71, %74 : vector<8x8xf32>
    %76 = math.exp %75 : vector<8x8xf32>
    %cst_34 = arith.constant dense<0.000000e+00> : vector<8xf32>
    %77 = vector.multi_reduction <add>, %76, %cst_34 [1] : vector<8x8xf32> to vector<8xf32>
    %78 = vector.shape_cast %77 : vector<8xf32> to vector<8x1xf32>
    %79 = tpu.reciprocal %78 {approx = true} : vector<8x1xf32> -> vector<8x1xf32>
    %cst_35 = arith.constant dense<0.000000e+00> : vector<8x8xf32>
    %80 = tpu.matmul %76, %68, %cst_35 {dimension_numbers = #tpu.dot_dimension_numbers<[1], [0], [0], [1], [0, 0, 1, 1], [], []>} : vector<8x8xf32>, vector<8x8xf32>, vector<8x8xf32> -> vector<8x8xf32>
    %81 = vector.broadcast %79 : vector<8x1xf32> to vector<8x8xf32>
    %82 = arith.mulf %80, %81 : vector<8x8xf32>
    %c0_36 = arith.constant 0 : index
    %c24_37 = arith.constant 24 : index
    %83 = vector.load %arg9[%c0_36, %c24_37] : memref<8x32xf32, #tpu.memory_space<vmem>>, vector<8x8xf32>
    tpu.vector_store %arg9[%c0_36, %c24_37], %82 {strides = array<i32>} : memref<8x32xf32, #tpu.memory_space<vmem>>, vector<8x8xf32>,
    %c0_38 = arith.constant 0 : index
    %c0_39 = arith.constant 0 : index
    %84 = vector.load %arg9[%c0_38, %c0_39] : memref<8x32xf32, #tpu.memory_space<vmem>>, vector<8x32xf32>
    %c0_40 = arith.constant 0 : index
    %c0_41 = arith.constant 0 : index
    %85 = vector.load %arg4[%c0_40, %c0_41] : memref<32x32xf32, #tpu.memory_space<vmem>>, vector<32x32xf32>
    %cst_42 = arith.constant dense<0.000000e+00> : vector<8x32xf32>
    %86 = tpu.matmul %84, %85, %cst_42 {dimension_numbers = #tpu.dot_dimension_numbers<[1], [0], [0], [1], [0, 0, 1, 1], [], []>} : vector<8x32xf32>, vector<32x32xf32>, vector<8x32xf32> -> vector<8x32xf32>
    %c0_43 = arith.constant 0 : index
    %c0_44 = arith.constant 0 : index
    %87 = vector.load %arg5[%c0_43, %c0_44] : memref<1x32xf32, #tpu.memory_space<vmem>>, vector<1x32xf32>
    %88 = vector.broadcast %87 : vector<1x32xf32> to vector<8x32xf32>
    %89 = arith.addf %86, %88 : vector<8x32xf32>
    %c0_45 = arith.constant 0 : index
    %c0_46 = arith.constant 0 : index
    %c0_47 = arith.constant 0 : index
    %90 = vector.load %arg6[%c0_45, %c0_46, %c0_47] : memref<1x8x32xf32, #tpu.memory_space<vmem>>, vector<1x8x32xf32>
    %91 = vector.shape_cast %90 : vector<1x8x32xf32> to vector<8x32xf32>
    %92 = vector.shape_cast %89 : vector<8x32xf32> to vector<1x8x32xf32>
    tpu.vector_store %arg6[%c0_45, %c0_46, %c0_47], %92 {strides = array<i32>} : memref<1x8x32xf32, #tpu.memory_space<vmem>>, vector<1x8x32xf32>,
    return
  }
  func.func @transform_0(%arg0: i32, %arg1: i32) -> (i32, i32, i32) {
    %c0_i32 = arith.constant 0 : i32
    %c0_i32_0 = arith.constant 0 : i32
    %c0_i32_1 = arith.constant 0 : i32
    return %arg0, %c0_i32, %c0_i32_0 : i32, i32, i32
  }
  func.func @transform_1(%arg0: i32, %arg1: i32) -> (i32, i32) {
    %c0_i32 = arith.constant 0 : i32
    %c0_i32_0 = arith.constant 0 : i32
    %c0_i32_1 = arith.constant 0 : i32
    return %c0_i32, %c0_i32_0 : i32, i32
  }
  func.func @transform_2(%arg0: i32, %arg1: i32) -> (i32, i32) {
    %c0_i32 = arith.constant 0 : i32
    %c0_i32_0 = arith.constant 0 : i32
    %c0_i32_1 = arith.constant 0 : i32
    return %c0_i32, %c0_i32_0 : i32, i32
  }
  func.func @transform_3(%arg0: i32, %arg1: i32) -> (i32, i32) {
    %c0_i32 = arith.constant 0 : i32
    %c0_i32_0 = arith.constant 0 : i32
    %c0_i32_1 = arith.constant 0 : i32
    return %c0_i32, %c0_i32_0 : i32, i32
  }
  func.func @transform_4(%arg0: i32, %arg1: i32) -> (i32, i32, i32) {
    %c0_i32 = arith.constant 0 : i32
    %c0_i32_0 = arith.constant 0 : i32
    return %arg0, %arg1, %c0_i32 : i32, i32, i32
  }
}

</mosaic_0001>

<bundles_post_ra>
// kernel: tpu_custom_call.1
= control target key start
LH: loop header
LB: loop body
LE: loop exit
PB: predicated region body
PF: predicated region fallthrough
CT: control target
= control target key end

     0   :  { %9 = vsyncpa [#allocation6], 0  ;;  %s1951_s0 = inlined_call_operand.hbm [shape: f32[2,8,32], index: 0, kind: input, shape index: {}]   ;;  %s1952_s1 = inlined_call_operand.hbm [shape: f32[32,96], index: 1, kind: input, shape index: {}]   ;;  %s1953_s2 = inlined_call_operand.hbm [shape: f32[32,32], index: 2, kind: input, shape index: {}]   ;;  %s1954_s3 = inlined_call_operand.vmem [shape: f32[1,32], index: 3, kind: input, shape index: {}]   ;;  %s1955_s4 = inlined_call_operand.hbm [shape: f32[2,8,32], index: 4, kind: output, shape index: {}]  }
   0x1   :  { %11 = vsyncpa [#allocation6 + $0x1], 0 }
   0x2   :  { %12 = vsyncpa [#allocation9], 0 }
   0x3   :  { %13 = vsyncpa [#allocation7], 0 }
   0x4   :  { %15 = vsyncpa [#allocation7 + $0x1], 0  ;;  %s1689_s15 = smov 0   ;;  %s1691_s16 = smov 0  }
   0x5   :  { %s1693_s17 = smov 0   ;;  %s1695_s18 = smov 0  }
   0x6   :  { %s1697_s19 = smov 0   ;;  %s1699_s20 = smov 0  }
   0x7 LB: > { %s1247_s21 = sadd.s32 4294967295, %s1644_s20   ;;  %s1248_s22 = sadd.s32 4294967294, %s1644_s20   ;;  %s1644_s20 = sphi %s1699_s20, %s21_s20   ;;  %s1640_s19 = sphi %s1697_s19, %s1975_s19   ;;  %s1636_s18 = sphi %s1695_s18, %s1974_s18   ;;  %s1632_s17 = sphi %s1693_s17, %s1973_s17   ;;  %s1628_s16 = sphi %s1691_s16, %s1972_s16   ;;  %s1624_s15 = sphi %s1689_s15, %s1971_s15  }
   0x8   : > { %p53_p0 = scmp.ne.s32.totalorder %s1628_s16, %s1624_s15  ;;  %p1723_p1 = scmp.eq.s32.totalorder %s1247_s21, 0 }
   0x9   : > { %p1727_p2 = scmp.eq.s32.totalorder %s1247_s21, 1  ;;  %p148_p3 = scmp.eq.s32.totalorder %s1248_s22, 1 }
   0xa   : > { %s1959_s23 = scalar_select %p1723_p1, 1, 0 }
   0xb   : > { %p1733_p4 = por %p1723_p1, %p53_p0  ;;  %p1249_p5 = scmp.ge.s32.totalorder %s1644_s20, 1 }
   0xc   : > { %p1738_p6 = por %p148_p3, %p53_p0  ;;  %p155_p7 = scmp.lt.s32.totalorder %s1644_s20, 3 }
   0xd   : > { %s1961_s25 = scalar_select %p1733_p4, 1, 0 }
   0xe   : > { %s1962_s26 = scalar_select %p1738_p6, 1, 0 }
   0xf   : > { %p1743_p8 = pnand %p1249_p5, %p155_p7  ;;  %s1646_s28 = smov [#allocation8]  }
  0x10   : > { %s167_s29 = sshll.u32 %s1646_s28, 4  ;;  %s1647_s5 = smov [#allocation10]   ;;  %s168_s29 = int_to_ptr.vmem [resolvable:$true] %s167_s29 }
  0x11   : > { %p1379_p9 = pneg %p1743_p8  ;;  %s180_s6 = sshll.u32 %s1647_s5, 4  ;;  %s181_s6 = int_to_ptr.vmem [resolvable:$true] %s180_s6 }
  0x12   : > { %s1491_s7 = scalar_lea.vmem %s168_s29, 512  ;;  %p1499_p5 = scmp.lt.s32.totalorder %s168_s29, %s168_s29 }
  0x13   : > { %p1752_p11 = pnand %p1379_p9, %p1723_p1  ;;  %p1492_p13 = scmp.ne.s32.totalorder %s168_s29, %s1491_s7 }
  0x14   : > { %p1500_p7 = scmp.lt.s32.totalorder %s1491_s7, %s1491_s7 }
  0x15   : > { %p1482_p12 = pneg %p1752_p11 }
  0x16   : > { %p1501_p10 = por %p1500_p7, %p1499_p5 }
  0x17   : > { %p1494_p0 = pnand %p1492_p13, %p1482_p12 }
  0x19   : > { %p1495_p3 = pneg %p1494_p0 }
  0x1b   : > { %p1502_p9 = pnand %p1501_p10, %p1495_p3 }
  0x1d   : > { %1505 = shalt.err (!%p1502_p9)
}
  0x1e   : > { %s1648_s8 = smov 128   ;;  %s1649_s9 = smov 8  }
  0x1f   : > { %1382 = dma.hbm_to_vmem [thread:$0]  (!%p1752_p11), %s1952_s1, 512, %s168_s29, [#allocation9], %s1648_s8, %s1648_s8, %s1649_s9  }
  0x20   : > { %s1517_s12 = scalar_lea.vmem %s181_s6, 512  ;;  %p1525_p1 = scmp.lt.s32.totalorder %s181_s6, %s181_s6 }
  0x21   : > { %p1518_p6 = scmp.ne.s32.totalorder %s181_s6, %s1517_s12  ;;  %p1526_p4 = scmp.lt.s32.totalorder %s1517_s12, %s1517_s12 }
  0x23   : > { %p1520_p13 = pnand %p1518_p6, %p1482_p12  ;;  %p1527_p5 = por %p1526_p4, %p1525_p1 }
  0x25   : > { %p1521_p0 = pneg %p1520_p13 }
  0x27   : > { %p1528_p10 = pnand %p1527_p5, %p1521_p0 }
  0x29   : > { %1531 = shalt.err (!%p1528_p10)
}
  0x2a   : > { %1385 = dma.hbm_to_vmem [thread:$0]  (!%p1752_p11), %s1953_s2, 512, %s181_s6, [#allocation9], %s1648_s8, %s1648_s8, %s1649_s9  }
  0x2b   : > { %s33_s21 = sadd.s32 1, %s1640_s19  ;;  %s40_s22 = sadd.s32 1, %s1632_s17 }
  0x2c   : > { %p35_p1 = scmp.ge.s32.totalorder %s33_s21, 2  ;;  %p47_p4 = scmp.ne.s32.totalorder %s1632_s17, %s1628_s16 }
  0x2d   : > { %p48_p6 = scmp.eq.s32.totalorder %s1644_s20, 0  ;;  %p1396_p12 = scmp.lt.s32.totalorder %s1644_s20, 2 }
  0x2e   : > { %s1977_s21 = smov (%p35_p1, %s33_s21), 0  ;;  %p1784_p7 = por %p1727_p2, %p47_p4 }
  0x2f   : > { %p49_p3 = por %p48_p6, %p47_p4  ;;  %s37_s29 = ssub.s32 %s1640_s19, %s1977_s21 }
  0x30   : > { %s197_s30 = sand.u32 1, %s1632_s17   ;;  %p38_p9 = scmp.eq.s32.totalorder %s37_s29, 0 }
  0x31   : > { %s1253_s5 = sshll.u32 %s197_s30, 3  ;;  %s1254_s6 = sshll.u32 %s1640_s19, 7 }
  0x32   : > { %s1793_s7 = scalar_select %p38_p9, %s1632_s17, %s40_s22  }
  0x33   : > { %s206_s10 = scalar_lea.hbm %s1951_s0, %s1254_s6  ;;  %s201_s11 = scalar_lea.vmem [#allocation5], %s1253_s5 }
  0x34   : > { %s208_s12 = sshll.u32 %s201_s11, 4  ;;  %p1800_p11 = pnand %p1396_p12, %p49_p3  ;;  %s209_s12 = int_to_ptr.vmem [resolvable:$true] %s208_s12 }
  0x35   : > { %s198_s13 = scalar_lea.sflag [#allocation6], %s197_s30  ;;  %s1545_s14 = scalar_lea.vmem %s209_s12, 128 }
  0x36   : > { %p1534_p2 = pneg %p1800_p11  ;;  %p1546_p13 = scmp.ne.s32.totalorder %s209_s12, %s1545_s14 }
  0x37   : > { %s1650_s22 = smov [#allocation5]  }
  0x38   : > { %p1548_p0 = pnand %p1546_p13, %p1534_p2  ;;  %s1550_s29 = sshll.u32 %s1650_s22, 4  ;;  %s1551_s29 = int_to_ptr.vmem [resolvable:$false] %s1550_s29 }
  0x39   : > { %s1552_s6 = scalar_lea.vmem %s1551_s29, 256  ;;  %p1553_p10 = scmp.lt.s32.totalorder %s209_s12, %s1551_s29 }
  0x3a   : > { %p1549_p5 = pneg %p1548_p0  ;;  %p1554_p1 = scmp.lt.s32.totalorder %s1552_s6, %s1545_s14 }
  0x3c   : > { %p1555_p4 = por %p1554_p1, %p1553_p10 }
  0x3e   : > { %p1556_p6 = pnand %p1555_p4, %p1549_p5 }
  0x40   : > { %1559 = shalt.err (!%p1556_p6)
}
  0x41   : > { %1389 = dma.hbm_to_vmem [thread:$0]  (!%p1800_p11), %s206_s10, 128, %s209_s12, %s198_s13  }
  0x42   : > { %217 = sbr.rel (%p1743_p8) target bundleno = 1644 (0x66c), region = 36  ;;  %s1811_s30 = sand.u32 (!%p1743_p8), 1, %s1628_s16  }
  0x43   : > { %s1256_s5 = sshll.u32 (!%p1743_p8), %s1811_s30, 3  ;;  %s220_s8 = scalar_lea.sflag (!%p1743_p8), [#allocation6], %s1811_s30 }
  0x44   : > { %s223_s9 = scalar_lea.vmem (!%p1743_p8), [#allocation5], %s1256_s5  ;;  %p1967_p12 = scmp.ne.s32.totalorder (!%p1743_p8), %s1961_s25, 0 }
  0x47   : > { %1611 = dma.done.wait (%p1967_p12), %s220_s8, 128  }
  0x48   : > { %1613 = vsyncadd (%p1967_p12), %s220_s8, 4294967168  ;;  %p1968_p3 = scmp.ne.s32.totalorder %s1959_s23, 0 }
  0x4a   : > { %1615 = dma.done.wait (%p1968_p3), [#allocation9], 1024  }
  0x4b   : > { %1617 = vsyncadd (%p1968_p3), [#allocation9], 4294966272  ;;  %v1651_v0 = vmov 0.0   ;;  %vm1652_vm0 = vmmov 0   ;;  %v264_v1 = vld [vmem:[#allocation8 + $0x18] sm:$0xff]  ;;  %v263_v2 = vld [vmem:[#allocation8 + $0x10] sm:$0xff]  ;;  %v346_v18 = vlaneseq }
  0x4c   : > { %1305 = vmatprep.subr.mxu0 %v1651_v0  ;;  %1313 = vmatprep.mubr.msk.f32.mxu0 %vm1652_vm0, %v1651_v0  ;;  %v262_v3 = vld [vmem:[#allocation8 + $0x8] sm:$0xff]  ;;  %v261_v4 = vld [vmem:[#allocation8] sm:$0xff]  ;;  %v260_v5 = vld [vmem:[%s223_s9] sm:$0xff]  ;;  %vm265_vm1 = vcmask 261120   ;;  %s1653_s23 = smov 96   ;;  %vm344_vm2 = vcmask 523264  }
  0x4d   : > { %1316 = vmatprep.subr.mxu1 %v1651_v0  ;;  %1318 = vmatprep.mubr.msk.f32.mxu1 %vm1652_vm0, %v1651_v0  ;;  %vm357_vm3 = vcmask 64512   ;;  %s1654_s25 = smov 120   ;;  %s1655_s27 = smov 112   ;;  %v347_v19 = vshrl.u32 %v346_v18, 7  ;;  %v352_v20 = vand.u32 127, %v346_v18  ;;  %vm695_vm5 = vcmask 130112  }
  0x4e   : > { %1306 = vmatpush3.msra.mxu0 %v264_v1  ;;  %s1656_s10 = smov 104   ;;  %s1657_s11 = smov 88   ;;  %vm869_vm6 = vcmask 195712   ;;  %vm1043_vm7 = vcmask 261312  }
  0x4f   : > { %1307 = vmatprep.subr.mxu0 %v1651_v0  ;;  %vm353_vm4 = vcmp.ge.s32.totalorder %v347_v19, %v352_v20  ;;  %s1658_s12 = smov 72   ;;  %s1659_s24 = smov 80  }
  0x50   : > { %1308 = vmatpush3.msra.mxu0 %v263_v2  ;;  %s1660_s13 = smov 8   ;;  %s1661_s14 = smov 16  }
  0x51   : > { %1309 = vmatprep.subr.mxu0 %v1651_v0  ;;  %s1662_s22 = smov 24   ;;  %s1276_s8 = sshll.u32 %s1636_s18, 7 }
  0x52   : > { %1310 = vmatpush3.msra.mxu0 %v262_v3  ;;  %s255_s9 = scalar_lea.vmem [#allocation11], %s1256_s5  ;;  %s1663_s18 = smov [#allocation11]  }
  0x53   : > { %1311 = vmatprep.subr.mxu0 %v1651_v0  ;;  %s1564_s5 = sshll.u32 %s1663_s18, 4  ;;  %s1565_s5 = int_to_ptr.vmem [resolvable:$false] %s1564_s5 }
  0x54   : > { %1312 = vmatpush3.msra.mxu0 %v261_v4 }
  0x55   : > { %1314 = vmatmul.mubr.msk.f32.vlgmr.msra.gmra.mxu0 %vm265_vm1, %v260_v5  ;;  %1336 = vmatprep.subr.mxu0 %v1651_v0  ;;  %v1049_v5 = vld [vmem:[#allocation10 + $0x18] sm:$0xff] }
  0x56   : > { %1338 = vmatprep.mubr.msk.f32.mxu0 %vm1652_vm0, %v1651_v0 }
 0x115   : > { %v335_v6 = vpop.f32.mrf.mxu0 }
 0x116   : > { %339 = vst.msk [vmem:[#allocation2] sm:$0xff] %vm265_vm1, %v335_v6  ;;  %341 = vrot.lane.b32.xlu0 %v335_v6, %s1653_s23  ;;  %v1048_v6 = vld [vmem:[#allocation10 + $0x10] sm:$0xff] }
 0x117   : > { %v1315_v7 = vpop.f32.mrf.mxu0 }
 0x11d   : > { %v355_v10 = vld [vmem:[#allocation2] sm:$0xff] }
 0x188   : > { %v342_v8 = vpop.permute.xlu0 %341 }
 0x189   : > { %345 = vst.msk [vmem:[#allocation3] sm:$0xff] %vm344_vm2, %v342_v8 }
 0x190   : > { %v1839_v9 = vld [vmem:[#allocation3] sm:$0xff] }
 0x191   : > { %445 = vrot.lane.b32.xlu1 %v1839_v9, %s1653_s23  ;;  %1317 = vmatpush3.xpose.msk.msra.mxu1 %vm357_vm3, %v1839_v9  ;;  %s1147_s23 = sshll.u32 %s255_s9, 4  ;;  %s1148_s23 = int_to_ptr.vmem [resolvable:$true] %s1147_s23 }
 0x192   : > { %1321 = vmatprep.subr.mxu1 %v1651_v0  ;;  %p1567_p2 = scmp.lt.s32.totalorder %s1148_s23, %s1565_s5 }
 0x194   : > { %1319 = vmatmul.mubr.msk.f32.vlgmr.msra.gmra.mxu1 %vm357_vm3, %v355_v10 }
 0x195   : > { %527 = vrot.lane.b32.xlu1 %v1839_v9, %s1654_s25  ;;  %1323 = vmatprep.mubr.msk.f32.mxu1 %vm1652_vm0, %v1651_v0 }
 0x199   : > { %524 = vrot.lane.b32.xlu1 %v355_v10, %s1654_s25 }
 0x19d   : > { %701 = vrot.lane.b32.xlu1 %v1839_v9, %s1655_s27 }
 0x1a1   : > { %698 = vrot.lane.b32.xlu1 %v355_v10, %s1655_s27 }
 0x1a5   : > { %875 = vrot.lane.b32.xlu1 %v1839_v9, %s1656_s10 }
 0x1a9   : > { %872 = vrot.lane.b32.xlu1 %v355_v10, %s1656_s10  ;;  %s1908_s10 = scalar_lea.hbm %s1955_s4, %s1276_s8 }
 0x203   : > { %v446_v11 = vpop.permute.xlu1 %445 }
 0x204   : > { %1322 = vmatpush3.msra.mxu1 %v446_v11 }
 0x205   : > { %1326 = vmatprep.subr.mxu1 %v1651_v0 }
 0x207   : > { %v528_v12 = vpop.permute.xlu1 %527 }
 0x20b   : > { %v525_v13 = vpop.permute.xlu1 %524 }
 0x20f   : > { %v702_v14 = vpop.permute.xlu1 %701 }
 0x210   : > { %1337 = vmatpush3.xpose.msk.msra.mxu0 %vm357_vm3, %v702_v14 }
 0x211   : > { %1346 = vmatprep.subr.mxu0 %v1651_v0 }
 0x213   : > { %v699_v15 = vpop.permute.xlu1 %698 }
 0x214   : > { %1339 = vmatmul.mubr.msk.f32.vlgmr.msra.gmra.mxu0 %vm357_vm3, %v699_v15 }
 0x215   : > { %1348 = vmatprep.mubr.msk.f32.mxu0 %vm1652_vm0, %v1651_v0 }
 0x217   : > { %v876_v16 = vpop.permute.xlu1 %875 }
 0x218   : > { %1347 = vmatpush3.xpose.msk.msra.mxu0 %vm357_vm3, %v876_v16 }
 0x219   : > { %1356 = vmatprep.subr.mxu0 %v1651_v0 }
 0x21b   : > { %v873_v17 = vpop.permute.xlu1 %872 }
 0x21c   : > { %1349 = vmatmul.mubr.msk.f32.vlgmr.msra.gmra.mxu0 %vm357_vm3, %v873_v17 }
 0x21d   : > { %1364 = vmatprep.mubr.msk.f32.mxu0 %vm1652_vm0, %v1651_v0  ;;  %1357 = vmatpush3.msra.mxu0 %v1049_v5 }
 0x21e   : > { %1358 = vmatprep.subr.mxu0 %v1651_v0 }
 0x21f   : > { %1359 = vmatpush3.msra.mxu0 %v1048_v6 }
 0x220   : > { %1360 = vmatprep.subr.mxu0 %v1651_v0 }
 0x254   : > { %v430_v21 = vpop.f32.mrf.mxu1 }
 0x255   : > { %v434_v22 = vsel %vm353_vm4, %v430_v21, -1e+30 }
 0x256   : > { %v1320_v23 = vpop.f32.mrf.mxu1  ;;  %v435_v24 = vsel %vm357_vm3, %v434_v22, -inf }
 0x257   : > { %436 = vmax.xlane.f32.xlu0 %v435_v24  ;;  %v1273_v24 = vld [vmem:[%s1954_s3] ss:$0 sm:$0xff] }
 0x26d   : > { %614 = vrot.lane.b32.xlu0 %v1839_v9, %s1657_s11  ;;  %s1133_s11 = scalar_lea.sflag [#allocation7], %s1811_s30 }
 0x2d4   : > { %v773_v25 = vpop.f32.mrf.mxu0 }
 0x2d5   : > { %v777_v26 = vsel %vm353_vm4, %v773_v25, -1e+30 }
 0x2d6   : > { %v1340_v27 = vpop.f32.mrf.mxu0  ;;  %v778_v28 = vsel %vm357_vm3, %v777_v26, -inf }
 0x2d7   : > { %779 = vmax.xlane.f32.xlu0 %v778_v28 }
 0x2dc   : > { %v947_v29 = vpop.f32.mrf.mxu0 }
 0x2dd   : > { %v951_v30 = vsel %vm353_vm4, %v947_v29, -1e+30 }
 0x2de   : > { %v1350_v31 = vpop.f32.mrf.mxu0  ;;  %v952_v32 = vsel %vm357_vm3, %v951_v30, -inf }
 0x2df   : > { %953 = vmax.xlane.f32.xlu0 %v952_v32 }
 0x2e0   : > { %v437_v33 = vpop.xlane.xlu0 %436 }
 0x2e1   : > { %v438_v34 = vsub.f32 %v434_v22, %v437_v33 }
 0x2e3   : > { %v439_v35 = vmul.f32 1.442695, %v438_v34 }
 0x2e4   : > { %v615_v37 = vpop.permute.xlu0 %614 }
 0x2e5   : > { %1464 = vpow2.f32 %v439_v35 }
 0x2f2   : > { %v1465_v36 = vpop.eup %1464 }
 0x2f3   : > { %1324 = vmatmul.mubr.msk.f32.vlgmr.msra.gmra.mxu1 %vm357_vm3, %v1465_v36  ;;  %v441_v61 = vsel %vm357_vm3, %v1465_v36, 0.0 }
 0x2f4   : > { %1327 = vmatpush3.xpose.msk.msra.mxu1 %vm357_vm3, %v528_v12  ;;  %1328 = vmatprep.mubr.msk.f32.mxu1 %vm1652_vm0, %v1651_v0  ;;  %v1046_v12 = vld [vmem:[#allocation10] sm:$0xff] }
 0x2f5   : > { %962 = vrot.lane.b32.xlu0 %v1839_v9, %s1658_s12  ;;  %1331 = vmatprep.subr.mxu1 %v1651_v0  ;;  %s1560_s12 = scalar_lea.vmem %s1148_s23, 128 }
 0x2f6   : > { %p1561_p8 = scmp.ne.s32.totalorder %s1148_s23, %s1560_s12 }
 0x2f7   : > { %1329 = vmatmul.mubr.msk.f32.vlgmr.msra.gmra.mxu1 %vm357_vm3, %v525_v13 }
 0x2f8   : > { %1332 = vmatpush3.msra.mxu1 %v615_v37  ;;  %1333 = vmatprep.mubr.msk.f32.mxu1 %vm1652_vm0, %v1651_v0  ;;  %p1562_p9 = pnand %p1561_p8, %p1784_p7 }
 0x2f9   : > { %1341 = vmatprep.subr.mxu1 %v1651_v0 }
 0x2fa   : > { %p1563_p11 = pneg %p1562_p9 }
 0x360   : > { %v780_v44 = vpop.xlane.xlu0 %779 }
 0x361   : > { %v781_v45 = vsub.f32 %v777_v26, %v780_v44 }
 0x363   : > { %v782_v46 = vmul.f32 1.442695, %v781_v45 }
 0x365   : > { %1466 = vpow2.f32 %v782_v46 }
 0x368   : > { %v954_v49 = vpop.xlane.xlu0 %953 }
 0x369   : > { %v955_v50 = vsub.f32 %v951_v30, %v954_v49 }
 0x36b   : > { %v956_v53 = vmul.f32 1.442695, %v955_v50 }
 0x36c   : > { %v963_v59 = vpop.permute.xlu0 %962 }
 0x372   : > { %v1467_v47 = vpop.eup %1466 }
 0x373   : > { %v784_v48 = vsel %vm357_vm3, %v1467_v47, 0.0 }
 0x3b3   : > { %v517_v38 = vpop.f32.mrf.mxu1 }
 0x3b5   : > { %v1325_v39 = vpop.f32.mrf.mxu1 }
 0x3b7   : > { %v599_v40 = vpop.f32.mrf.mxu1 }
 0x3b8   : > { %v603_v41 = vsel %vm353_vm4, %v599_v40, -1e+30 }
 0x3b9   : > { %v1330_v42 = vpop.f32.mrf.mxu1  ;;  %v604_v43 = vsel %vm357_vm3, %v603_v41, -inf }
 0x3ba   : > { %605 = vmax.xlane.f32.xlu1 %v604_v43 }
 0x3cb   : > { %788 = vrot.lane.b32.xlu1 %v1839_v9, %s1659_s24  ;;  %v1047_v9 = vld [vmem:[#allocation10 + $0x8] sm:$0xff]  ;;  %s1566_s24 = scalar_lea.vmem %s1565_s5, 256 }
 0x3cc   : > { %1361 = vmatpush3.msra.mxu0 %v1047_v9  ;;  %p1568_p13 = scmp.lt.s32.totalorder %s1566_s24, %s1560_s12 }
 0x3cd   : > { %1362 = vmatprep.subr.mxu0 %v1651_v0 }
 0x3ce   : > { %1363 = vmatpush3.msra.mxu0 %v1046_v12  ;;  %p1569_p0 = por %p1568_p13, %p1567_p2 }
 0x3d0   : > { %p1570_p5 = pnand %p1569_p0, %p1563_p11 }
 0x3ef   : > { %785 = vadd.xlane.f32.xlu1 %v784_v48 }
 0x443   : > { %v606_v51 = vpop.xlane.xlu1 %605 }
 0x444   : > { %v607_v52 = vsub.f32 %v603_v41, %v606_v51 }
 0x446   : > { %v608_v54 = vmul.f32 1.442695, %v607_v52 }
 0x447   : > { %v789_v56 = vpop.permute.xlu1 %788 }
 0x448   : > { %1468 = vpow2.f32 %v608_v54 }
 0x449   : > { %1470 = vpow2.f32 %v956_v53 }
 0x455   : > { %v1469_v55 = vpop.eup %1468 }
 0x456   : > { %1334 = vmatmul.mubr.msk.f32.vlgmr.msra.gmra.mxu1 %vm357_vm3, %v1469_v55  ;;  %v610_v57 = vsel %vm357_vm3, %v1469_v55, 0.0  ;;  %v1471_v58 = vpop.eup %1470 }
 0x457   : > { %1342 = vmatpush3.msra.mxu1 %v789_v56  ;;  %611 = vadd.xlane.f32.xlu0 %v610_v57  ;;  %v958_v60 = vsel %vm357_vm3, %v1471_v58, 0.0 }
 0x458   : > { %1343 = vmatprep.mubr.msk.f32.mxu1 %vm1652_vm0, %v1651_v0  ;;  %1351 = vmatprep.subr.mxu1 %v1651_v0 }
 0x45a   : > { %1344 = vmatmul.mubr.msk.f32.vlgmr.msra.gmra.mxu1 %vm357_vm3, %v1467_v47 }
 0x45b   : > { %1352 = vmatpush3.msra.mxu1 %v963_v59  ;;  %959 = vadd.xlane.f32.xlu0 %v958_v60 }
 0x45c   : > { %1353 = vmatprep.mubr.msk.f32.mxu1 %vm1652_vm0, %v1651_v0 }
 0x45e   : > { %1354 = vmatmul.mubr.msk.f32.vlgmr.msra.gmra.mxu1 %vm357_vm3, %v1471_v58 }
 0x45f   : > { %442 = vadd.xlane.f32.xlu0 %v441_v61 }
 0x478   : > { %v786_v4 = vpop.xlane.xlu1 %785 }
 0x4e0   : > { %v612_v62 = vpop.xlane.xlu0 %611 }
 0x4e4   : > { %v960_v63 = vpop.xlane.xlu0 %959 }
 0x4e8   : > { %v443_v1 = vpop.xlane.xlu0 %442 }
 0x4e9   : > { %1472 = vrcp.f32 %v443_v1 }
 0x4ea   : > { %1474 = vrcp.f32 %v612_v62 }
 0x4eb   : > { %1476 = vrcp.f32 %v786_v4 }
 0x4ec   : > { %1478 = vrcp.f32 %v960_v63 }
 0x4f6   : > { %v1473_v2 = vpop.eup %1472 }
 0x4f7   : > { %v521_v3 = vmul.f32 %v1473_v2, %v517_v38  ;;  %v1475_v7 = vpop.eup %1474 }
 0x4f8   : > { %v1477_v13 = vpop.eup %1476 }
 0x4f9   : > { %522 = vst.msk [vmem:[#allocation4] sm:$0xff] %vm357_vm3, %v521_v3  ;;  %v1479_v17 = vpop.eup %1478 }
 0x516   : > { %v686_v8 = vpop.f32.mrf.mxu1 }
 0x517   : > { %v690_v10 = vmul.f32 %v1475_v7, %v686_v8 }
 0x518   : > { %v1335_v11 = vpop.f32.mrf.mxu1 }
 0x519   : > { %692 = vrot.lane.b32.xlu0 %v690_v10, %s1660_s13 }
 0x51a   : > { %v860_v14 = vpop.f32.mrf.mxu1 }
 0x51b   : > { %v864_v15 = vmul.f32 %v1477_v13, %v860_v14 }
 0x51c   : > { %v1345_v16 = vpop.f32.mrf.mxu1 }
 0x51d   : > { %866 = vrot.lane.b32.xlu1 %v864_v15, %s1661_s14 }
 0x51e   : > { %v1034_v18 = vpop.f32.mrf.mxu1 }
 0x51f   : > { %v1038_v19 = vmul.f32 %v1479_v17, %v1034_v18 }
 0x520   : > { %v1355_v20 = vpop.f32.mrf.mxu1 }
 0x521   : > { %1040 = vrot.lane.b32.xlu0 %v1038_v19, %s1662_s22 }
 0x58b   : > { %v693_v21 = vpop.permute.xlu0 %692 }
 0x58c   : > { %696 = vst.msk [vmem:[#allocation4] sm:$0xff] %vm695_vm5, %v693_v21 }
 0x58f   : > { %v867_v22 = vpop.permute.xlu1 %866 }
 0x590   : > { %870 = vst.msk [vmem:[#allocation4] sm:$0xff] %vm869_vm6, %v867_v22 }
 0x593   : > { %v1041_v0 = vpop.permute.xlu0 %1040 }
 0x594   : > { %1044 = vst.msk [vmem:[#allocation4] sm:$0xff] %vm1043_vm7, %v1041_v0 }
 0x59b   : > { %v1045_v23 = vld [vmem:[#allocation4] sm:$0xff] }
 0x59c   : > { %1365 = vmatmul.mubr.msk.f32.vlgmr.msra.gmra.mxu0 %vm265_vm1, %v1045_v23 }
 0x65c   : > { %v1127_v25 = vpop.f32.mrf.mxu0 }
 0x65d   : > { %v1128_v26 = vadd.f32 %v1273_v24, %v1127_v25 }
 0x65e   : > { %v1366_v27 = vpop.f32.mrf.mxu0 }
 0x65f   : > { %1131 = vst.msk [vmem:[%s255_s9] sm:$0xff] %vm265_vm1, %v1128_v26 }
 0x660   : > { %1573 = shalt.err (!%p1570_p5)
}
 0x661   : > { %s1574_s13 = scalar_lea.hbm %s1908_s10, 128  ;;  %s1578_s22 = scalar_lea.hbm %s1955_s4, 256 }
 0x662   : > { %p1575_p10 = scmp.ne.s32.totalorder %s1908_s10, %s1574_s13  ;;  %p1579_p6 = scmp.lt.s32.totalorder %s1908_s10, %s1955_s4 }
 0x663   : > { %p1580_p12 = scmp.lt.s32.totalorder %s1578_s22, %s1574_s13 }
 0x664   : > { %p1576_p1 = pnand %p1575_p10, %p1784_p7 }
 0x665   : > { %p1581_p3 = por %p1580_p12, %p1579_p6 }
 0x666   : > { %p1577_p4 = pneg %p1576_p1 }
 0x668   : > { %p1582_p8 = pnand %p1581_p3, %p1577_p4 }
 0x66a   : > { %1585 = shalt.err (!%p1582_p8)
}
 0x66b   : > { %1377 = dma.vmem_to_hbm [thread:$0]  (%p1784_p7), %s1148_s23, 128, %s1908_s10, %s1133_s11  }
 0x66c PF: > { %s1159_s8 = sand.u32 1, %s1624_s15   ;;  %p1969_p9 = scmp.ne.s32.totalorder %s1962_s26, 0 }
 0x66d   : > { %p1970_p11 = scmp.ge.s32.totalorder %s1644_s20, 2  ;;  %s1160_s9 = scalar_lea.sflag [#allocation7], %s1159_s8 }
 0x66f   : > { %p1391_p2 = pnand %p1970_p11, %p1969_p9 }
 0x671   : > { %p1392_p13 = pneg %p1391_p2 }
 0x673   : > { %1619 = dma.done.wait (%p1392_p13), %s1160_s9, 128  }
 0x674   : > { %1621 = vsyncadd (%p1392_p13), %s1160_s9, 4294967168  ;;  %s21_s20 = sadd.s32 1, %s1644_s20   ;;  %s1971_s15 = smov %s1628_s16 }
 0x675   : > { %p18_p0 = scmp.ge.s32.totalorder %s21_s20, 4   ;;  %s1972_s16 = smov %s1632_s17 }
 0x676   : > { %s1973_s17 = smov %s1793_s7  ;;  %s1974_s18 = smov %s1640_s19 }
 0x677   : > { %s1975_s19 = smov %s1977_s21  ;;  %20 = sbr.rel (!%p18_p0) target bundleno = 7 (0x7), region = 94 }
 0x67c   :  { %1165 = vsyncpa [#allocation6], 1 }
 0x67d   :  { %1167 = vsyncpa [#allocation6 + $0x1], 1 }
 0x67e   :  { %1168 = vsyncpa [#allocation9], 1 }
 0x67f   :  { %1169 = vsyncpa [#allocation7], 1 }
 0x680   :  { %1171 = vsyncpa [#allocation7 + $0x1], 1 }

</bundles_post_ra>
